<compile_context>
chip_gen: v6e
topology: v6e:2x2x1
jax: 0.10.0
libtpu: 0.0.40
codegen_flags: <defaults>
</compile_context>

<pallas_src>
import functools

import jax
import jax.numpy as jnp
from jax.experimental import pallas as pl
from jax.experimental.pallas import tpu as pltpu


def _round_up(v, m):
    return ((v + m - 1) // m) * m


def _mlp4_kernel(x_ref, w_ref, b_ref, o_ref):
    """Fused forward: relu(relu(relu(x@W1+b1)@W2+b2)@W3+b3)@W4+b4 on padded tiles."""
    h = x_ref[...]
    # Three hidden layers with ReLU (static unroll; w_ref[i]/b_ref[i] are static slices).
    for i in range(3):
        h = jnp.dot(h, w_ref[i], preferred_element_type=jnp.float32) + b_ref[i]
        h = jnp.maximum(h, 0.0)
    # Output layer (no activation), lane-dense padded store.
    o_ref[...] = (jnp.dot(h, w_ref[3], preferred_element_type=jnp.float32)
                  + b_ref[3]).astype(o_ref.dtype)


def pack_params(params):
    """Pack per-layer (in,out) weights and (1,out) biases into zero-padded slabs.

    Returns:
      w_slab: f32[4, D, D]   (row-padded to D in, col-padded to D out)
      b_slab: f32[4, 1, D]
    where D is the max layer dim rounded up to a multiple of 128.
    """
    ws = [params[f"w{i}"] for i in range(1, 5)]
    bs = [params[f"b{i}"] for i in range(1, 5)]
    D = 128
    for w in ws:
        D = max(D, _round_up(w.shape[0], 128), _round_up(w.shape[1], 128))
    w_slab = jnp.stack([
        jnp.pad(w, ((0, D - w.shape[0]), (0, D - w.shape[1]))) for w in ws
    ]).astype(jnp.float32)
    b_slab = jnp.stack([
        jnp.pad(b.reshape(1, -1), ((0, 0), (0, D - b.shape[-1]))) for b in bs
    ]).astype(jnp.float32)
    return w_slab, b_slab


@functools.partial(jax.jit, static_argnames=("n_classes",))
def mlp4_forward(x, w_slab, b_slab, *, n_classes):
    """x: (B, n_input) float32. w_slab: (4, D, D). b_slab: (4, 1, D)."""
    B, n_input = x.shape
    D = w_slab.shape[-1]

    # Batch tiling: whole batch in one block when small; 256-row blocks otherwise.
    B8 = _round_up(B, 8)
    if B8 <= 256:
        tm, b_pad = B8, B8
    else:
        tm = 256
        b_pad = _round_up(B8, tm)

    # Zero-pad activations to (b_pad, D): padded lanes/rows stay zero through the net.
    x_p = jnp.zeros((b_pad, D), jnp.float32).at[:B, :n_input].set(x)

    out_p = pl.pallas_call(
        _mlp4_kernel,
        out_shape=jax.ShapeDtypeStruct((b_pad, D), jnp.float32),
        grid=(b_pad // tm,),
        in_specs=[
            pl.BlockSpec((tm, D), lambda i: (i, 0)),        # activations: pipelined
            pl.BlockSpec((4, D, D), lambda i: (0, 0, 0)),   # weight slab: VMEM-resident
            pl.BlockSpec((4, 1, D), lambda i: (0, 0, 0)),   # bias slab:   VMEM-resident
        ],
        out_specs=pl.BlockSpec((tm, D), lambda i: (i, 0)),
        compiler_params=pltpu.CompilerParams(
            dimension_semantics=("parallel",)),             # split batch across TCs (v7x)
    )(x_p, w_slab, b_slab)

    return out_p[:B, :n_classes]


def init_params(key, n_input, n_classes):
    """nn.Linear-style init: U(-1/sqrt(fan_in), 1/sqrt(fan_in)).

    Weights stored (in_features, out_features) so y = x @ W + b.
    """
    dims = [n_input, 16, 16, 16, n_classes]
    params = {}
    keys = jax.random.split(key, 8)
    for i in range(4):
        fan_in, fan_out = dims[i], dims[i + 1]
        bound = 1.0 / jnp.sqrt(jnp.float32(fan_in))
        params[f"w{i + 1}"] = jax.random.uniform(
            keys[2 * i], (fan_in, fan_out), minval=-bound, maxval=bound,
            dtype=jnp.float32)
        params[f"b{i + 1}"] = jax.random.uniform(
            keys[2 * i + 1], (1, fan_out), minval=-bound, maxval=bound,
            dtype=jnp.float32)
    return params


def mlp4_reference(x, params):
    h = jax.nn.relu(x @ params["w1"] + params["b1"])
    h = jax.nn.relu(h @ params["w2"] + params["b2"])
    h = jax.nn.relu(h @ params["w3"] + params["b3"])
    return h @ params["w4"] + params["b4"]


if __name__ == "__main__":
    key = jax.random.PRNGKey(0)
    k_param, k_x = jax.random.split(key)

    batch = 8
    n_input = 32
    n_classes = 4

    params = init_params(k_param, n_input, n_classes)
    w_slab, b_slab = pack_params(params)
    x = jax.random.normal(k_x, (batch, n_input), dtype=jnp.float32)

    out = mlp4_forward(x, w_slab, b_slab, n_classes=n_classes)
    out = jax.block_until_ready(out)

    ref = mlp4_reference(x, params)
    assert out.shape == (batch, n_classes)
    assert jnp.allclose(out, ref, atol=1e-5, rtol=1e-5), "mismatch vs reference"

    print("KERNEL_OK")
</pallas_src>

<mosaic_0001>
module attributes {stable_mosaic.version = 11 : i64} {
  func.func @_mlp4_kernel(%arg0: i32, %arg1: memref<8x128xf32, #tpu.memory_space<vmem>>, %arg2: memref<4x128x128xf32, #tpu.memory_space<vmem>>, %arg3: memref<4x1x128xf32, #tpu.memory_space<vmem>>, %arg4: memref<8x128xf32, #tpu.memory_space<vmem>>) attributes {dimension_semantics = [#tpu.dimension_semantics<parallel>], iteration_bounds = array<i64: 1>, scalar_prefetch = 0 : i64, scratch_operands = 0 : i64, tpu.core_type = #tpu.core_type<tc>, window_params = [{transform_indices = @transform_0, window_bounds = array<i64: 8, 128>}, {pipeline_mode = #tpu.pipeline_mode<synchronous>, transform_indices = @transform_1, window_bounds = array<i64: 4, 128, 128>}, {pipeline_mode = #tpu.pipeline_mode<synchronous>, transform_indices = @transform_2, window_bounds = array<i64: 4, 1, 128>}, {transform_indices = @transform_3, window_bounds = array<i64: 8, 128>}]} {
    %c0 = arith.constant 0 : index
    %c0_0 = arith.constant 0 : index
    %0 = vector.load %arg1[%c0, %c0_0] : memref<8x128xf32, #tpu.memory_space<vmem>>, vector<8x128xf32>
    %c0_1 = arith.constant 0 : index
    %c0_2 = arith.constant 0 : index
    %c0_3 = arith.constant 0 : index
    %1 = vector.load %arg2[%c0_1, %c0_2, %c0_3] : memref<4x128x128xf32, #tpu.memory_space<vmem>>, vector<1x128x128xf32>
    %2 = vector.shape_cast %1 : vector<1x128x128xf32> to vector<128x128xf32>
    %cst = arith.constant dense<0.000000e+00> : vector<8x128xf32>
    %3 = tpu.matmul %0, %2, %cst {dimension_numbers = #tpu.dot_dimension_numbers<[1], [0], [0], [1], [0, 0, 1, 1], [], []>} : vector<8x128xf32>, vector<128x128xf32>, vector<8x128xf32> -> vector<8x128xf32>
    %c0_4 = arith.constant 0 : index
    %c0_5 = arith.constant 0 : index
    %c0_6 = arith.constant 0 : index
    %4 = vector.load %arg3[%c0_4, %c0_5, %c0_6] : memref<4x1x128xf32, #tpu.memory_space<vmem>>, vector<1x1x128xf32>
    %5 = vector.shape_cast %4 : vector<1x1x128xf32> to vector<1x128xf32>
    %6 = vector.broadcast %5 : vector<1x128xf32> to vector<8x128xf32>
    %7 = arith.addf %3, %6 : vector<8x128xf32>
    %cst_7 = arith.constant 0.000000e+00 : f32
    %8 = vector.broadcast %cst_7 : f32 to vector<8x128xf32>
    %9 = arith.maximumf %7, %8 : vector<8x128xf32>
    %c1 = arith.constant 1 : index
    %c0_8 = arith.constant 0 : index
    %c0_9 = arith.constant 0 : index
    %10 = vector.load %arg2[%c1, %c0_8, %c0_9] : memref<4x128x128xf32, #tpu.memory_space<vmem>>, vector<1x128x128xf32>
    %11 = vector.shape_cast %10 : vector<1x128x128xf32> to vector<128x128xf32>
    %cst_10 = arith.constant dense<0.000000e+00> : vector<8x128xf32>
    %12 = tpu.matmul %9, %11, %cst_10 {dimension_numbers = #tpu.dot_dimension_numbers<[1], [0], [0], [1], [0, 0, 1, 1], [], []>} : vector<8x128xf32>, vector<128x128xf32>, vector<8x128xf32> -> vector<8x128xf32>
    %c1_11 = arith.constant 1 : index
    %c0_12 = arith.constant 0 : index
    %c0_13 = arith.constant 0 : index
    %13 = vector.load %arg3[%c1_11, %c0_12, %c0_13] : memref<4x1x128xf32, #tpu.memory_space<vmem>>, vector<1x1x128xf32>
    %14 = vector.shape_cast %13 : vector<1x1x128xf32> to vector<1x128xf32>
    %15 = vector.broadcast %14 : vector<1x128xf32> to vector<8x128xf32>
    %16 = arith.addf %12, %15 : vector<8x128xf32>
    %cst_14 = arith.constant 0.000000e+00 : f32
    %17 = vector.broadcast %cst_14 : f32 to vector<8x128xf32>
    %18 = arith.maximumf %16, %17 : vector<8x128xf32>
    %c2 = arith.constant 2 : index
    %c0_15 = arith.constant 0 : index
    %c0_16 = arith.constant 0 : index
    %19 = vector.load %arg2[%c2, %c0_15, %c0_16] : memref<4x128x128xf32, #tpu.memory_space<vmem>>, vector<1x128x128xf32>
    %20 = vector.shape_cast %19 : vector<1x128x128xf32> to vector<128x128xf32>
    %cst_17 = arith.constant dense<0.000000e+00> : vector<8x128xf32>
    %21 = tpu.matmul %18, %20, %cst_17 {dimension_numbers = #tpu.dot_dimension_numbers<[1], [0], [0], [1], [0, 0, 1, 1], [], []>} : vector<8x128xf32>, vector<128x128xf32>, vector<8x128xf32> -> vector<8x128xf32>
    %c2_18 = arith.constant 2 : index
    %c0_19 = arith.constant 0 : index
    %c0_20 = arith.constant 0 : index
    %22 = vector.load %arg3[%c2_18, %c0_19, %c0_20] : memref<4x1x128xf32, #tpu.memory_space<vmem>>, vector<1x1x128xf32>
    %23 = vector.shape_cast %22 : vector<1x1x128xf32> to vector<1x128xf32>
    %24 = vector.broadcast %23 : vector<1x128xf32> to vector<8x128xf32>
    %25 = arith.addf %21, %24 : vector<8x128xf32>
    %cst_21 = arith.constant 0.000000e+00 : f32
    %26 = vector.broadcast %cst_21 : f32 to vector<8x128xf32>
    %27 = arith.maximumf %25, %26 : vector<8x128xf32>
    %c3 = arith.constant 3 : index
    %c0_22 = arith.constant 0 : index
    %c0_23 = arith.constant 0 : index
    %28 = vector.load %arg2[%c3, %c0_22, %c0_23] : memref<4x128x128xf32, #tpu.memory_space<vmem>>, vector<1x128x128xf32>
    %29 = vector.shape_cast %28 : vector<1x128x128xf32> to vector<128x128xf32>
    %cst_24 = arith.constant dense<0.000000e+00> : vector<8x128xf32>
    %30 = tpu.matmul %27, %29, %cst_24 {dimension_numbers = #tpu.dot_dimension_numbers<[1], [0], [0], [1], [0, 0, 1, 1], [], []>} : vector<8x128xf32>, vector<128x128xf32>, vector<8x128xf32> -> vector<8x128xf32>
    %c3_25 = arith.constant 3 : index
    %c0_26 = arith.constant 0 : index
    %c0_27 = arith.constant 0 : index
    %31 = vector.load %arg3[%c3_25, %c0_26, %c0_27] : memref<4x1x128xf32, #tpu.memory_space<vmem>>, vector<1x1x128xf32>
    %32 = vector.shape_cast %31 : vector<1x1x128xf32> to vector<1x128xf32>
    %33 = vector.broadcast %32 : vector<1x128xf32> to vector<8x128xf32>
    %34 = arith.addf %30, %33 : vector<8x128xf32>
    %c0_28 = arith.constant 0 : index
    %c0_29 = arith.constant 0 : index
    %35 = vector.load %arg4[%c0_28, %c0_29] : memref<8x128xf32, #tpu.memory_space<vmem>>, vector<8x128xf32>
    tpu.vector_store %arg4[%c0_28, %c0_29], %34 {strides = array<i32>} : memref<8x128xf32, #tpu.memory_space<vmem>>, vector<8x128xf32>,
    return
  }
  func.func @transform_0(%arg0: i32) -> (i32, i32) {
    %c0_i32 = arith.constant 0 : i32
    %c0_i32_0 = arith.constant 0 : i32
    return %arg0, %c0_i32 : i32, i32
  }
  func.func @transform_1(%arg0: i32) -> (i32, i32, i32) {
    %c0_i32 = arith.constant 0 : i32
    %c0_i32_0 = arith.constant 0 : i32
    %c0_i32_1 = arith.constant 0 : i32
    %c0_i32_2 = arith.constant 0 : i32
    return %c0_i32, %c0_i32_0, %c0_i32_1 : i32, i32, i32
  }
  func.func @transform_2(%arg0: i32) -> (i32, i32, i32) {
    %c0_i32 = arith.constant 0 : i32
    %c0_i32_0 = arith.constant 0 : i32
    %c0_i32_1 = arith.constant 0 : i32
    %c0_i32_2 = arith.constant 0 : i32
    return %c0_i32, %c0_i32_0, %c0_i32_1 : i32, i32, i32
  }
  func.func @transform_3(%arg0: i32) -> (i32, i32) {
    %c0_i32 = arith.constant 0 : i32
    %c0_i32_0 = arith.constant 0 : i32
    return %arg0, %c0_i32 : i32, i32
  }
}

</mosaic_0001>

<bundles_post_ra>
// kernel: mlp4_forward.1
= control target key start
LH: loop header
LB: loop body
LE: loop exit
PB: predicated region body
PF: predicated region fallthrough
CT: control target
= control target key end

     0   :  { %8 = vsyncpa [#allocation3], 0  ;;  %s658_s12 = smov [#allocation2]   ;;  %s776_s0 = inlined_call_operand.vmem [shape: f32[8,128], index: 0, kind: input, shape index: {}]   ;;  %s777_s1 = inlined_call_operand.hbm [shape: f32[4,128,128], index: 1, kind: input, shape index: {}]   ;;  %s778_s2 = inlined_call_operand.vmem [shape: f32[4,1,128], index: 2, kind: input, shape index: {}]   ;;  %s779_s3 = inlined_call_operand.vmem [shape: f32[8,128], index: 3, kind: output, shape index: {}]  }
   0x1   :  { %s16_s13 = sshll.u32 %s658_s12, 4  ;;  %s17_s13 = int_to_ptr.vmem [resolvable:$true] %s16_s13 }
   0x2   :  { %s644_s14 = scalar_lea.vmem %s17_s13, 8192  ;;  %p649_p1 = scmp.lt.s32.totalorder %s17_s13, %s17_s13 }
   0x3   :  { %p645_p0 = scmp.ne.s32.totalorder %s17_s13, %s644_s14  ;;  %p650_p2 = scmp.lt.s32.totalorder %s644_s14, %s644_s14 }
   0x5   :  { %p651_p3 = por %p650_p2, %p649_p1 }
   0x7   :  { %p652_p4 = pnand %p651_p3, %p645_p0 }
   0x9   :  { %655 = shalt.err (!%p652_p4)
}
   0xa   :  { %s659_s15 = smov 128   ;;  %s660_s16 = smov 8  }
   0xb   :  { %22 = dma.hbm_to_vmem [thread:$0]  %s777_s1, 8192, %s17_s13, [#allocation3], %s659_s15, %s659_s15, %s660_s16  }
   0xc   :  { %656 = dma.done.wait [#allocation3], 8192  }
   0xd   :  { %657 = vsyncadd [#allocation3], 4294959104  ;;  %v661_v0 = vmov 0.0   ;;  %vm662_vm0 = vmmov 0   ;;  %v44_v1 = vld [vmem:[#allocation2 + $0x78] sm:$0xff]  ;;  %v43_v2 = vld [vmem:[#allocation2 + $0x70] sm:$0xff] }
   0xe   :  { %491 = vmatprep.subr.mxu0 %v661_v0  ;;  %523 = vmatprep.mubr.msk.f32.mxu0 %vm662_vm0, %v661_v0  ;;  %v42_v3 = vld [vmem:[#allocation2 + $0x68] sm:$0xff]  ;;  %v41_v4 = vld [vmem:[#allocation2 + $0x60] sm:$0xff]  ;;  %v139_v5 = vld [vmem:[#allocation2 + $0xf8] sm:$0xff] }
   0xf   :  { %526 = vmatprep.subr.mxu1 %v661_v0  ;;  %558 = vmatprep.mubr.msk.f32.mxu1 %vm662_vm0, %v661_v0  ;;  %v40_v6 = vld [vmem:[#allocation2 + $0x58] sm:$0xff]  ;;  %v138_v7 = vld [vmem:[#allocation2 + $0xf0] sm:$0xff]  ;;  %v137_v8 = vld [vmem:[#allocation2 + $0xe8] sm:$0xff] }
  0x10   :  { %492 = vmatpush3.msra.mxu0 %v44_v1  ;;  %527 = vmatpush3.msra.mxu1 %v139_v5  ;;  %v39_v9 = vld [vmem:[#allocation2 + $0x50] sm:$0xff]  ;;  %v136_v10 = vld [vmem:[#allocation2 + $0xe0] sm:$0xff]  ;;  %v38_v11 = vld [vmem:[#allocation2 + $0x48] sm:$0xff] }
  0x11   :  { %493 = vmatprep.subr.mxu0 %v661_v0  ;;  %528 = vmatprep.subr.mxu1 %v661_v0  ;;  %v135_v12 = vld [vmem:[#allocation2 + $0xd8] sm:$0xff]  ;;  %v37_v13 = vld [vmem:[#allocation2 + $0x40] sm:$0xff]  ;;  %v134_v14 = vld [vmem:[#allocation2 + $0xd0] sm:$0xff] }
  0x12   :  { %494 = vmatpush3.msra.mxu0 %v43_v2  ;;  %529 = vmatpush3.msra.mxu1 %v138_v7  ;;  %v36_v15 = vld [vmem:[#allocation2 + $0x38] sm:$0xff]  ;;  %v133_v16 = vld [vmem:[#allocation2 + $0xc8] sm:$0xff]  ;;  %v35_v17 = vld [vmem:[#allocation2 + $0x30] sm:$0xff] }
  0x13   :  { %495 = vmatprep.subr.mxu0 %v661_v0  ;;  %530 = vmatprep.subr.mxu1 %v661_v0  ;;  %v132_v18 = vld [vmem:[#allocation2 + $0xc0] sm:$0xff]  ;;  %v34_v19 = vld [vmem:[#allocation2 + $0x28] sm:$0xff]  ;;  %v131_v20 = vld [vmem:[#allocation2 + $0xb8] sm:$0xff] }
  0x14   :  { %496 = vmatpush3.msra.mxu0 %v42_v3  ;;  %531 = vmatpush3.msra.mxu1 %v137_v8  ;;  %v33_v21 = vld [vmem:[#allocation2 + $0x20] sm:$0xff]  ;;  %v130_v22 = vld [vmem:[#allocation2 + $0xb0] sm:$0xff]  ;;  %v32_v23 = vld [vmem:[#allocation2 + $0x18] sm:$0xff] }
  0x15   :  { %497 = vmatprep.subr.mxu0 %v661_v0  ;;  %532 = vmatprep.subr.mxu1 %v661_v0  ;;  %v129_v24 = vld [vmem:[#allocation2 + $0xa8] sm:$0xff]  ;;  %v31_v25 = vld [vmem:[#allocation2 + $0x10] sm:$0xff]  ;;  %v128_v26 = vld [vmem:[#allocation2 + $0xa0] sm:$0xff] }
  0x16   :  { %498 = vmatpush3.msra.mxu0 %v41_v4  ;;  %533 = vmatpush3.msra.mxu1 %v136_v10  ;;  %v30_v27 = vld [vmem:[#allocation2 + $0x8] sm:$0xff]  ;;  %v127_v28 = vld [vmem:[#allocation2 + $0x98] sm:$0xff]  ;;  %v29_v29 = vld [vmem:[#allocation2] sm:$0xff] }
  0x17   :  { %499 = vmatprep.subr.mxu0 %v661_v0  ;;  %534 = vmatprep.subr.mxu1 %v661_v0  ;;  %v28_v30 = vld [vmem:[%s776_s0] sm:$0xff]  ;;  %v126_v31 = vld [vmem:[#allocation2 + $0x90] sm:$0xff]  ;;  %v125_v32 = vld [vmem:[#allocation2 + $0x88] sm:$0xff] }
  0x18   :  { %500 = vmatpush3.msra.mxu0 %v40_v6  ;;  %535 = vmatpush3.msra.mxu1 %v135_v12  ;;  %v124_v33 = vld [vmem:[#allocation2 + $0x80] sm:$0xff]  ;;  %v235_v34 = vld [vmem:[#allocation2 + $0x178] sm:$0xff]  ;;  %v234_v35 = vld [vmem:[#allocation2 + $0x170] sm:$0xff] }
  0x19   :  { %501 = vmatprep.subr.mxu0 %v661_v0  ;;  %536 = vmatprep.subr.mxu1 %v661_v0  ;;  %v233_v36 = vld [vmem:[#allocation2 + $0x168] sm:$0xff]  ;;  %v232_v37 = vld [vmem:[#allocation2 + $0x160] sm:$0xff]  ;;  %v231_v38 = vld [vmem:[#allocation2 + $0x158] sm:$0xff] }
  0x1a   :  { %502 = vmatpush3.msra.mxu0 %v39_v9  ;;  %537 = vmatpush3.msra.mxu1 %v134_v14  ;;  %v230_v39 = vld [vmem:[#allocation2 + $0x150] sm:$0xff]  ;;  %v229_v40 = vld [vmem:[#allocation2 + $0x148] sm:$0xff]  ;;  %v228_v41 = vld [vmem:[#allocation2 + $0x140] sm:$0xff] }
  0x1b   :  { %503 = vmatprep.subr.mxu0 %v661_v0  ;;  %538 = vmatprep.subr.mxu1 %v661_v0  ;;  %v227_v42 = vld [vmem:[#allocation2 + $0x138] sm:$0xff]  ;;  %v226_v43 = vld [vmem:[#allocation2 + $0x130] sm:$0xff]  ;;  %v225_v44 = vld [vmem:[#allocation2 + $0x128] sm:$0xff] }
  0x1c   :  { %504 = vmatpush3.msra.mxu0 %v38_v11  ;;  %539 = vmatpush3.msra.mxu1 %v133_v16  ;;  %v224_v45 = vld [vmem:[#allocation2 + $0x120] sm:$0xff]  ;;  %v223_v46 = vld [vmem:[#allocation2 + $0x118] sm:$0xff]  ;;  %v222_v52 = vld [vmem:[#allocation2 + $0x110] sm:$0xff] }
  0x1d   :  { %505 = vmatprep.subr.mxu0 %v661_v0  ;;  %540 = vmatprep.subr.mxu1 %v661_v0  ;;  %v416_v47 = vld [vmem:[%s778_s2] ss:$0 sm:$0xff]  ;;  %v221_v53 = vld [vmem:[#allocation2 + $0x108] sm:$0xff]  ;;  %v331_v55 = vld [vmem:[#allocation2 + $0x1f8] sm:$0xff] }
  0x1e   :  { %506 = vmatpush3.msra.mxu0 %v37_v13  ;;  %541 = vmatpush3.msra.mxu1 %v132_v18  ;;  %v220_v54 = vld [vmem:[#allocation2 + $0x100] sm:$0xff]  ;;  %v330_v56 = vld [vmem:[#allocation2 + $0x1f0] sm:$0xff]  ;;  %v329_v57 = vld [vmem:[#allocation2 + $0x1e8] sm:$0xff] }
  0x1f   :  { %507 = vmatprep.subr.mxu0 %v661_v0  ;;  %542 = vmatprep.subr.mxu1 %v661_v0  ;;  %v328_v58 = vld [vmem:[#allocation2 + $0x1e0] sm:$0xff]  ;;  %v327_v59 = vld [vmem:[#allocation2 + $0x1d8] sm:$0xff]  ;;  %v326_v60 = vld [vmem:[#allocation2 + $0x1d0] sm:$0xff] }
  0x20   :  { %508 = vmatpush3.msra.mxu0 %v36_v15  ;;  %543 = vmatpush3.msra.mxu1 %v131_v20  ;;  %v325_v61 = vld [vmem:[#allocation2 + $0x1c8] sm:$0xff]  ;;  %v324_v62 = vld [vmem:[#allocation2 + $0x1c0] sm:$0xff]  ;;  %v323_v63 = vld [vmem:[#allocation2 + $0x1b8] sm:$0xff] }
  0x21   :  { %509 = vmatprep.subr.mxu0 %v661_v0  ;;  %544 = vmatprep.subr.mxu1 %v661_v0  ;;  %v322_v1 = vld [vmem:[#allocation2 + $0x1b0] sm:$0xff]  ;;  %v321_v2 = vld [vmem:[#allocation2 + $0x1a8] sm:$0xff]  ;;  %v320_v3 = vld [vmem:[#allocation2 + $0x1a0] sm:$0xff] }
  0x22   :  { %510 = vmatpush3.msra.mxu0 %v35_v17  ;;  %545 = vmatpush3.msra.mxu1 %v130_v22  ;;  %v319_v4 = vld [vmem:[#allocation2 + $0x198] sm:$0xff]  ;;  %v418_v5 = vld [vmem:[%s778_s2 + $0x1] ss:$0 sm:$0xff]  ;;  %v318_v10 = vld [vmem:[#allocation2 + $0x190] sm:$0xff] }
  0x23   :  { %511 = vmatprep.subr.mxu0 %v661_v0  ;;  %546 = vmatprep.subr.mxu1 %v661_v0  ;;  %v317_v11 = vld [vmem:[#allocation2 + $0x188] sm:$0xff]  ;;  %v316_v12 = vld [vmem:[#allocation2 + $0x180] sm:$0xff] }
  0x24   :  { %512 = vmatpush3.msra.mxu0 %v34_v19  ;;  %547 = vmatpush3.msra.mxu1 %v129_v24  ;;  %v420_v13 = vld [vmem:[%s778_s2 + $0x2] ss:$0 sm:$0xff]  ;;  %v422_v18 = vld [vmem:[%s778_s2 + $0x3] ss:$0 sm:$0xff] }
  0x25   :  { %513 = vmatprep.subr.mxu0 %v661_v0  ;;  %548 = vmatprep.subr.mxu1 %v661_v0 }
  0x26   :  { %514 = vmatpush3.msra.mxu0 %v33_v21  ;;  %549 = vmatpush3.msra.mxu1 %v128_v26 }
  0x27   :  { %515 = vmatprep.subr.mxu0 %v661_v0  ;;  %550 = vmatprep.subr.mxu1 %v661_v0 }
  0x28   :  { %516 = vmatpush3.msra.mxu0 %v32_v23  ;;  %551 = vmatpush3.msra.mxu1 %v127_v28 }
  0x29   :  { %517 = vmatprep.subr.mxu0 %v661_v0  ;;  %552 = vmatprep.subr.mxu1 %v661_v0 }
  0x2a   :  { %518 = vmatpush3.msra.mxu0 %v31_v25  ;;  %553 = vmatpush3.msra.mxu1 %v126_v31 }
  0x2b   :  { %519 = vmatprep.subr.mxu0 %v661_v0  ;;  %554 = vmatprep.subr.mxu1 %v661_v0 }
  0x2c   :  { %520 = vmatpush3.msra.mxu0 %v30_v27  ;;  %555 = vmatpush3.msra.mxu1 %v125_v32 }
  0x2d   :  { %521 = vmatprep.subr.mxu0 %v661_v0  ;;  %556 = vmatprep.subr.mxu1 %v661_v0 }
  0x2e   :  { %522 = vmatpush3.msra.mxu0 %v29_v29  ;;  %557 = vmatpush3.msra.mxu1 %v124_v33 }
  0x2f   :  { %524 = vmatmul.mubr.f32.vlgmr.msra.gmra.mxu0 %v28_v30  ;;  %561 = vmatprep.subr.mxu0 %v661_v0 }
  0x30   :  { %593 = vmatprep.mubr.msk.f32.mxu0 %vm662_vm0, %v661_v0  ;;  %596 = vmatprep.subr.mxu1 %v661_v0 }
  0x31   :  { %562 = vmatpush3.msra.mxu0 %v235_v34 }
  0x32   :  { %563 = vmatprep.subr.mxu0 %v661_v0 }
  0x33   :  { %564 = vmatpush3.msra.mxu0 %v234_v35 }
  0x34   :  { %565 = vmatprep.subr.mxu0 %v661_v0 }
  0x35   :  { %566 = vmatpush3.msra.mxu0 %v233_v36 }
  0x36   :  { %567 = vmatprep.subr.mxu0 %v661_v0 }
  0x37   :  { %568 = vmatpush3.msra.mxu0 %v232_v37 }
  0x38   :  { %569 = vmatprep.subr.mxu0 %v661_v0 }
  0x39   :  { %570 = vmatpush3.msra.mxu0 %v231_v38 }
  0x3a   :  { %571 = vmatprep.subr.mxu0 %v661_v0 }
  0x3b   :  { %572 = vmatpush3.msra.mxu0 %v230_v39 }
  0x3c   :  { %573 = vmatprep.subr.mxu0 %v661_v0 }
  0x3d   :  { %574 = vmatpush3.msra.mxu0 %v229_v40 }
  0x3e   :  { %575 = vmatprep.subr.mxu0 %v661_v0 }
  0x3f   :  { %576 = vmatpush3.msra.mxu0 %v228_v41 }
  0x40   :  { %577 = vmatprep.subr.mxu0 %v661_v0 }
  0x41   :  { %578 = vmatpush3.msra.mxu0 %v227_v42 }
  0x42   :  { %579 = vmatprep.subr.mxu0 %v661_v0 }
  0x43   :  { %580 = vmatpush3.msra.mxu0 %v226_v43 }
  0x44   :  { %581 = vmatprep.subr.mxu0 %v661_v0 }
  0x45   :  { %582 = vmatpush3.msra.mxu0 %v225_v44 }
  0x46   :  { %583 = vmatprep.subr.mxu0 %v661_v0 }
  0x47   :  { %584 = vmatpush3.msra.mxu0 %v224_v45 }
  0x48   :  { %585 = vmatprep.subr.mxu0 %v661_v0 }
  0x49   :  { %586 = vmatpush3.msra.mxu0 %v223_v46 }
  0x4a   :  { %587 = vmatprep.subr.mxu0 %v661_v0 }
  0x4b   :  { %588 = vmatpush3.msra.mxu0 %v222_v52 }
  0x4c   :  { %589 = vmatprep.subr.mxu0 %v661_v0 }
  0x4d   :  { %590 = vmatpush3.msra.mxu0 %v221_v53 }
  0x4e   :  { %591 = vmatprep.subr.mxu0 %v661_v0 }
  0x4f   :  { %592 = vmatpush3.msra.mxu0 %v220_v54 }
  0xef   :  { %v118_v48 = vpop.f32.mrf.mxu0 }
  0xf0   :  { %v119_v49 = vadd.f32 %v416_v47, %v118_v48 }
  0xf1   :  { %v525_v50 = vpop.f32.mrf.mxu0 }
  0xf2   :  { %v122_v51 = vmax.f32 %v119_v49, 0.0 }
  0xf4   :  { %559 = vmatmul.mubr.f32.vlgmr.msra.gmra.mxu1 %v122_v51 }
  0xf5   :  { %628 = vmatprep.mubr.msk.f32.mxu1 %vm662_vm0, %v661_v0  ;;  %597 = vmatpush3.msra.mxu1 %v331_v55 }
  0xf6   :  { %598 = vmatprep.subr.mxu1 %v661_v0 }
  0xf7   :  { %599 = vmatpush3.msra.mxu1 %v330_v56 }
  0xf8   :  { %600 = vmatprep.subr.mxu1 %v661_v0 }
  0xf9   :  { %601 = vmatpush3.msra.mxu1 %v329_v57 }
  0xfa   :  { %602 = vmatprep.subr.mxu1 %v661_v0 }
  0xfb   :  { %603 = vmatpush3.msra.mxu1 %v328_v58 }
  0xfc   :  { %604 = vmatprep.subr.mxu1 %v661_v0 }
  0xfd   :  { %605 = vmatpush3.msra.mxu1 %v327_v59 }
  0xfe   :  { %606 = vmatprep.subr.mxu1 %v661_v0 }
  0xff   :  { %607 = vmatpush3.msra.mxu1 %v326_v60 }
 0x100   :  { %608 = vmatprep.subr.mxu1 %v661_v0 }
 0x101   :  { %609 = vmatpush3.msra.mxu1 %v325_v61 }
 0x102   :  { %610 = vmatprep.subr.mxu1 %v661_v0 }
 0x103   :  { %611 = vmatpush3.msra.mxu1 %v324_v62 }
 0x104   :  { %612 = vmatprep.subr.mxu1 %v661_v0 }
 0x105   :  { %613 = vmatpush3.msra.mxu1 %v323_v63 }
 0x106   :  { %614 = vmatprep.subr.mxu1 %v661_v0 }
 0x107   :  { %615 = vmatpush3.msra.mxu1 %v322_v1 }
 0x108   :  { %616 = vmatprep.subr.mxu1 %v661_v0 }
 0x109   :  { %617 = vmatpush3.msra.mxu1 %v321_v2 }
 0x10a   :  { %618 = vmatprep.subr.mxu1 %v661_v0 }
 0x10b   :  { %619 = vmatpush3.msra.mxu1 %v320_v3 }
 0x10c   :  { %620 = vmatprep.subr.mxu1 %v661_v0 }
 0x10d   :  { %621 = vmatpush3.msra.mxu1 %v319_v4 }
 0x10e   :  { %622 = vmatprep.subr.mxu1 %v661_v0 }
 0x10f   :  { %623 = vmatpush3.msra.mxu1 %v318_v10 }
 0x110   :  { %624 = vmatprep.subr.mxu1 %v661_v0 }
 0x111   :  { %625 = vmatpush3.msra.mxu1 %v317_v11 }
 0x112   :  { %626 = vmatprep.subr.mxu1 %v661_v0 }
 0x113   :  { %627 = vmatpush3.msra.mxu1 %v316_v12 }
 0x1b4   :  { %v214_v6 = vpop.f32.mrf.mxu1 }
 0x1b5   :  { %v215_v7 = vadd.f32 %v418_v5, %v214_v6 }
 0x1b6   :  { %v560_v8 = vpop.f32.mrf.mxu1 }
 0x1b7   :  { %v218_v9 = vmax.f32 %v215_v7, 0.0 }
 0x1b9   :  { %594 = vmatmul.mubr.f32.vlgmr.msra.gmra.mxu0 %v218_v9 }
 0x279   :  { %v310_v14 = vpop.f32.mrf.mxu0 }
 0x27a   :  { %v311_v15 = vadd.f32 %v420_v13, %v310_v14 }
 0x27b   :  { %v595_v16 = vpop.f32.mrf.mxu0 }
 0x27c   :  { %v314_v17 = vmax.f32 %v311_v15, 0.0 }
 0x27e   :  { %629 = vmatmul.mubr.f32.vlgmr.msra.gmra.mxu1 %v314_v17 }
 0x33e   :  { %v406_v19 = vpop.f32.mrf.mxu1 }
 0x33f   :  { %v407_v20 = vadd.f32 %v422_v18, %v406_v19 }
 0x340   :  { %v630_v21 = vpop.f32.mrf.mxu1 }
 0x341   :  { %410 = vst [vmem:[%s779_s3] sm:$0xff] %v407_v20 }
 0x342   :  { %415 = vsyncpa [#allocation3], 1 }

</bundles_post_ra>
